<compile_context>
chip_gen: v6e
topology: v6e:2x2x1
jax: 0.10.0
libtpu: 0.0.40
codegen_flags: <defaults>
</compile_context>

<pallas_src>
import math

import jax
import jax.numpy as jnp
from jax.experimental import pallas as pl
from jax.experimental.pallas import tpu as pltpu

dim_dec = 512   # LSTM hidden size feeding the projection
dim_freq = 80   # mel channels (projection output)

# Conservative whole-problem VMEM budget for the single-block path (v7x has
# 64 MiB physical / 32 MiB scoped default; leave plenty of headroom).
_SINGLE_BLOCK_VMEM_BUDGET = 24 * 1024 * 1024  # bytes


def _round_up(x, m):
    return ((x + m - 1) // m) * m


# ----------------------------------------------------------------------------
# Kernels
# ----------------------------------------------------------------------------
def _linear_single_block_kernel(x_ref, w_ref, b_ref, o_ref):
    # x: (M, K)  w: (K, N)  b: (1, N)  o: (M, N) -- whole problem resident in
    # VMEM, single invocation: one MXU matmul + bias add, store directly.
    acc = jnp.dot(x_ref[...], w_ref[...], preferred_element_type=jnp.float32)
    o_ref[...] = (acc + b_ref[...].astype(jnp.float32)).astype(o_ref.dtype)


def _linear_tiled_full_k_kernel(x_ref, w_ref, b_ref, o_ref):
    # Grid (i, j); full K per step -> no scratch, no revisits, no pl.when.
    acc = jnp.dot(x_ref[...], w_ref[...], preferred_element_type=jnp.float32)
    o_ref[...] = (acc + b_ref[...].astype(jnp.float32)).astype(o_ref.dtype)


def _linear_tiled_k_split_kernel(x_ref, w_ref, b_ref, o_ref, acc_ref):
    # Grid (i, j, k); K is the innermost (reduction) axis with an f32
    # accumulator resident across K tiles.  Only used when K is too large to
    # keep resident per (i, j) tile.
    k = pl.program_id(2)

    @pl.when(k == 0)
    def _():
        acc_ref[...] = jnp.zeros_like(acc_ref)

    acc_ref[...] += jnp.dot(
        x_ref[...], w_ref[...], preferred_element_type=jnp.float32
    )

    @pl.when(k == pl.num_programs(2) - 1)
    def _():
        out = acc_ref[...] + b_ref[...].astype(jnp.float32)
        o_ref[...] = out.astype(o_ref.dtype)


# ----------------------------------------------------------------------------
# Param prep (done ONCE at init / checkpoint-load time, not per call)
# ----------------------------------------------------------------------------
def prepare_linear_params(weight, bias):
    """Convert PyTorch-layout params (out_dim, in_dim)/(out_dim,) to the
    kernel layout: W^T of shape (in_dim, out_dim) and bias of shape
    (1, out_dim).  Hoisted out of the forward path so the per-call wrapper
    emits no transpose/pad XLA ops."""
    w_t = jnp.asarray(weight).T              # (K, N)
    b2d = jnp.asarray(bias).reshape(1, -1)   # (1, N)
    return w_t, b2d


# ----------------------------------------------------------------------------
# Forward wrapper
# ----------------------------------------------------------------------------
def linear_norm(x, w_t, b2d, *, tm=256, tn=256, tk=None):
    """y = x @ W^T + b  (W supplied pre-transposed as (in_dim, out_dim)).

    x: (..., in_dim), w_t: (in_dim, out_dim), b2d: (1, out_dim)
    """
    in_dim = x.shape[-1]
    out_dim = w_t.shape[-1]
    assert w_t.shape[0] == in_dim and b2d.shape == (1, out_dim)
    lead_shape = x.shape[:-1]
    m = math.prod(lead_shape) if lead_shape else 1
    x2d = x.reshape(m, in_dim)

    itemsize = jnp.dtype(x.dtype).itemsize
    total_bytes = (m * in_dim + in_dim * out_dim + out_dim + m * out_dim) * itemsize

    # ---------------- Fast path: whole problem in one VMEM block -------------
    if total_bytes <= _SINGLE_BLOCK_VMEM_BUDGET:
        cost = pl.CostEstimate(
            flops=2 * m * out_dim * in_dim,
            transcendentals=0,
            bytes_accessed=total_bytes,
        )
        out = pl.pallas_call(
            _linear_single_block_kernel,
            out_shape=jax.ShapeDtypeStruct((m, out_dim), x.dtype),
            in_specs=[
                pl.BlockSpec(memory_space=pltpu.MemorySpace.VMEM),  # x (M, K)
                pl.BlockSpec(memory_space=pltpu.MemorySpace.VMEM),  # W^T (K, N)
                pl.BlockSpec(memory_space=pltpu.MemorySpace.VMEM),  # bias (1, N)
            ],
            out_specs=pl.BlockSpec(memory_space=pltpu.MemorySpace.VMEM),
            cost_estimate=cost,
        )(x2d, w_t, b2d)
        return out.reshape(*lead_shape, out_dim)

    # ---------------- Generic tiled path (large problems only) ---------------
    # NOTE: for bf16/int8 inputs the second-to-last block dims below would
    # need 16/32 multiples; this path assumes f32.
    kp_full = _round_up(in_dim, 128)
    if tk is None:
        tk = min(kp_full, 2048)   # prefer full-K per step when it fits
    tk = min(tk, kp_full)
    tm = min(tm, _round_up(m, 8))
    tn = min(tn, _round_up(out_dim, 128))

    mp = _round_up(m, tm)
    np_ = _round_up(out_dim, tn)
    kp = _round_up(in_dim, tk)

    # TODO(synk): for production, pre-pad W^T/bias once at param-prep time
    # instead of per call (here only the large-problem fallback pays this).
    x2d_p = jnp.pad(x2d, ((0, mp - m), (0, kp - in_dim)))
    w_p = jnp.pad(w_t, ((0, kp - in_dim), (0, np_ - out_dim)))
    b_p = jnp.pad(b2d, ((0, 0), (0, np_ - out_dim)))

    cost = pl.CostEstimate(
        flops=2 * mp * np_ * kp,
        transcendentals=0,
        bytes_accessed=(mp * kp + kp * np_ + np_ + mp * np_) * itemsize,
    )

    k_steps = kp // tk
    if k_steps == 1:
        out = pl.pallas_call(
            _linear_tiled_full_k_kernel,
            out_shape=jax.ShapeDtypeStruct((mp, np_), x.dtype),
            grid=(mp // tm, np_ // tn),
            in_specs=[
                pl.BlockSpec((tm, tk), lambda i, j: (i, 0)),
                pl.BlockSpec((tk, tn), lambda i, j: (0, j)),
                pl.BlockSpec((1, tn), lambda i, j: (0, j)),
            ],
            out_specs=pl.BlockSpec((tm, tn), lambda i, j: (i, j)),
            compiler_params=pltpu.CompilerParams(
                dimension_semantics=("parallel", "parallel"),
            ),
            cost_estimate=cost,
        )(x2d_p, w_p, b_p)
    else:
        out = pl.pallas_call(
            _linear_tiled_k_split_kernel,
            out_shape=jax.ShapeDtypeStruct((mp, np_), x.dtype),
            grid=(mp // tm, np_ // tn, k_steps),
            in_specs=[
                pl.BlockSpec((tm, tk), lambda i, j, k: (i, k)),
                pl.BlockSpec((tk, tn), lambda i, j, k: (k, j)),
                pl.BlockSpec((1, tn), lambda i, j, k: (0, j)),
            ],
            out_specs=pl.BlockSpec((tm, tn), lambda i, j, k: (i, j)),
            scratch_shapes=[pltpu.VMEM((tm, tn), jnp.float32)],
            compiler_params=pltpu.CompilerParams(
                dimension_semantics=("parallel", "parallel", "arbitrary"),
            ),
            cost_estimate=cost,
        )(x2d_p, w_p, b_p)

    return out[:m, :out_dim].reshape(*lead_shape, out_dim)


# ----------------------------------------------------------------------------
# Param init matching LinearNorm.__init__ semantics
# ----------------------------------------------------------------------------
def init_linear_norm_params(key, in_dim, out_dim, w_init_gain="linear"):
    assert w_init_gain == "linear"
    gain = 1.0  # torch.nn.init.calculate_gain('linear') == 1.0
    a = gain * math.sqrt(6.0 / (in_dim + out_dim))  # xavier_uniform_
    k_w, k_b = jax.random.split(key)
    weight = jax.random.uniform(
        k_w, (out_dim, in_dim), minval=-a, maxval=a, dtype=jnp.float32
    )
    # PyTorch default Linear bias init: U(-1/sqrt(fan_in), 1/sqrt(fan_in))
    bound = 1.0 / math.sqrt(in_dim)
    bias = jax.random.uniform(
        k_b, (out_dim,), minval=-bound, maxval=bound, dtype=jnp.float32
    )
    return weight, bias


if __name__ == "__main__":
    key = jax.random.PRNGKey(0)
    k_x, k_p = jax.random.split(key)

    # Decoder.linear_projection shapes: (batch, seq, dim_dec) -> (batch, seq, dim_freq)
    batch, seq = 2, 8
    in_dim, out_dim = dim_dec, dim_freq  # 512 -> 80

    x = jax.random.normal(k_x, (batch, seq, in_dim), dtype=jnp.float32)
    weight, bias = init_linear_norm_params(k_p, in_dim, out_dim)

    # One-time param prep (transpose hoisted out of the forward path).
    w_t, b2d = prepare_linear_params(weight, bias)

    y = linear_norm(x, w_t, b2d)
    y = jax.block_until_ready(y)

    # Reference check against plain JAX.
    y_ref = x @ weight.T + bias
    assert y.shape == (batch, seq, out_dim)
    assert jnp.allclose(y, y_ref, atol=1e-5, rtol=1e-5)

    print("KERNEL_OK")
</pallas_src>

<mosaic_0001>
module attributes {stable_mosaic.version = 11 : i64} {
  func.func @_linear_single_block_kernel(%arg0: memref<16x512xf32, #tpu.memory_space<vmem>>, %arg1: memref<512x80xf32, #tpu.memory_space<vmem>>, %arg2: memref<1x80xf32, #tpu.memory_space<vmem>>, %arg3: memref<16x80xf32, #tpu.memory_space<vmem>>) attributes {dimension_semantics = [], scalar_prefetch = 0 : i64, scratch_operands = 0 : i64, tpu.core_type = #tpu.core_type<tc>} {
    %c0 = arith.constant 0 : index
    %c0_0 = arith.constant 0 : index
    %0 = vector.load %arg0[%c0, %c0_0] : memref<16x512xf32, #tpu.memory_space<vmem>>, vector<16x512xf32>
    %c0_1 = arith.constant 0 : index
    %c0_2 = arith.constant 0 : index
    %1 = vector.load %arg1[%c0_1, %c0_2] : memref<512x80xf32, #tpu.memory_space<vmem>>, vector<512x80xf32>
    %cst = arith.constant dense<0.000000e+00> : vector<16x80xf32>
    %2 = tpu.matmul %0, %1, %cst {dimension_numbers = #tpu.dot_dimension_numbers<[1], [0], [0], [1], [0, 0, 1, 1], [], []>} : vector<16x512xf32>, vector<512x80xf32>, vector<16x80xf32> -> vector<16x80xf32>
    %c0_3 = arith.constant 0 : index
    %c0_4 = arith.constant 0 : index
    %3 = vector.load %arg2[%c0_3, %c0_4] : memref<1x80xf32, #tpu.memory_space<vmem>>, vector<1x80xf32>
    %4 = vector.broadcast %3 : vector<1x80xf32> to vector<16x80xf32>
    %5 = arith.addf %2, %4 : vector<16x80xf32>
    %c0_5 = arith.constant 0 : index
    %c0_6 = arith.constant 0 : index
    %6 = vector.load %arg3[%c0_5, %c0_6] : memref<16x80xf32, #tpu.memory_space<vmem>>, vector<16x80xf32>
    tpu.vector_store %arg3[%c0_5, %c0_6], %5 {strides = array<i32>} : memref<16x80xf32, #tpu.memory_space<vmem>>, vector<16x80xf32>,
    return
  }
}

</mosaic_0001>

<bundles_post_ra>
// kernel: tpu_custom_call.1
= control target key start
LH: loop header
LB: loop body
LE: loop exit
PB: predicated region body
PF: predicated region fallthrough
CT: control target
= control target key end

     0   :  { %s610_s0 = inlined_call_operand.vmem [shape: f32[16,512], index: 0, kind: input, shape index: {}]   ;;  %s611_s1 = inlined_call_operand.vmem [shape: f32[512,80], index: 1, kind: input, shape index: {}]   ;;  %s612_s2 = inlined_call_operand.vmem [shape: f32[1,80], index: 2, kind: input, shape index: {}]   ;;  %s613_s3 = inlined_call_operand.hbm [shape: f32[16,80], index: 3, kind: output, shape index: {}]  }
   0x1   :  { %v54_v0 = vld [vmem:[%s611_s1 + $0xf8] sm:$0xff]  ;;  %v53_v4 = vld [vmem:[%s611_s1 + $0xf0] sm:$0xff]  ;;  %v52_v8 = vld [vmem:[%s611_s1 + $0xe8] sm:$0xff] }
   0x2   :  { %v86_v1 = vld [vmem:[%s611_s1 + $0x1f8] sm:$0xff]  ;;  %264 = vmatprep.subr.mxu0 %v54_v0  ;;  %v85_v5 = vld [vmem:[%s611_s1 + $0x1f0] sm:$0xff]  ;;  %v84_v9 = vld [vmem:[%s611_s1 + $0x1e8] sm:$0xff] }
   0x3   :  { %v38_v2 = vld [vmem:[%s611_s1 + $0x78] sm:$0xff]  ;;  %302 = vmatprep.subr.mxu1 %v86_v1  ;;  %v37_v6 = vld [vmem:[%s611_s1 + $0x70] sm:$0xff]  ;;  %v36_v10 = vld [vmem:[%s611_s1 + $0x68] sm:$0xff] }
   0x4   :  { %v70_v3 = vld [vmem:[%s611_s1 + $0x178] sm:$0xff]  ;;  %265 = vmatpush3.msra.mxu0 %v38_v2  ;;  %v69_v7 = vld [vmem:[%s611_s1 + $0x170] sm:$0xff]  ;;  %v68_v11 = vld [vmem:[%s611_s1 + $0x168] sm:$0xff] }
   0x5   :  { %303 = vmatpush3.msra.mxu1 %v70_v3  ;;  %266 = vmatprep.subr.mxu0 %v53_v4  ;;  %v51_v12 = vld [vmem:[%s611_s1 + $0xe0] sm:$0xff]  ;;  %v50_v16 = vld [vmem:[%s611_s1 + $0xd8] sm:$0xff]  ;;  %v49_v20 = vld [vmem:[%s611_s1 + $0xd0] sm:$0xff] }
   0x6   :  { %304 = vmatprep.subr.mxu1 %v85_v5  ;;  %267 = vmatpush3.msra.mxu0 %v37_v6  ;;  %v83_v13 = vld [vmem:[%s611_s1 + $0x1e0] sm:$0xff]  ;;  %v82_v17 = vld [vmem:[%s611_s1 + $0x1d8] sm:$0xff]  ;;  %v81_v21 = vld [vmem:[%s611_s1 + $0x1d0] sm:$0xff] }
   0x7   :  { %305 = vmatpush3.msra.mxu1 %v69_v7  ;;  %268 = vmatprep.subr.mxu0 %v52_v8  ;;  %v35_v14 = vld [vmem:[%s611_s1 + $0x60] sm:$0xff]  ;;  %v34_v18 = vld [vmem:[%s611_s1 + $0x58] sm:$0xff]  ;;  %v33_v22 = vld [vmem:[%s611_s1 + $0x50] sm:$0xff] }
   0x8   :  { %306 = vmatprep.subr.mxu1 %v84_v9  ;;  %v67_v15 = vld [vmem:[%s611_s1 + $0x160] sm:$0xff]  ;;  %269 = vmatpush3.msra.mxu0 %v36_v10  ;;  %v66_v19 = vld [vmem:[%s611_s1 + $0x158] sm:$0xff]  ;;  %v65_v23 = vld [vmem:[%s611_s1 + $0x150] sm:$0xff] }
   0x9   :  { %307 = vmatpush3.msra.mxu1 %v68_v11  ;;  %270 = vmatprep.subr.mxu0 %v51_v12  ;;  %v48_v24 = vld [vmem:[%s611_s1 + $0xc8] sm:$0xff]  ;;  %v47_v28 = vld [vmem:[%s611_s1 + $0xc0] sm:$0xff]  ;;  %v46_v32 = vld [vmem:[%s611_s1 + $0xb8] sm:$0xff] }
   0xa   :  { %308 = vmatprep.subr.mxu1 %v83_v13  ;;  %271 = vmatpush3.msra.mxu0 %v35_v14  ;;  %v80_v25 = vld [vmem:[%s611_s1 + $0x1c8] sm:$0xff]  ;;  %v79_v29 = vld [vmem:[%s611_s1 + $0x1c0] sm:$0xff]  ;;  %v78_v33 = vld [vmem:[%s611_s1 + $0x1b8] sm:$0xff] }
   0xb   :  { %309 = vmatpush3.msra.mxu1 %v67_v15  ;;  %272 = vmatprep.subr.mxu0 %v50_v16  ;;  %v32_v26 = vld [vmem:[%s611_s1 + $0x48] sm:$0xff]  ;;  %v31_v30 = vld [vmem:[%s611_s1 + $0x40] sm:$0xff]  ;;  %v30_v34 = vld [vmem:[%s611_s1 + $0x38] sm:$0xff] }
   0xc   :  { %310 = vmatprep.subr.mxu1 %v82_v17  ;;  %273 = vmatpush3.msra.mxu0 %v34_v18  ;;  %v64_v27 = vld [vmem:[%s611_s1 + $0x148] sm:$0xff]  ;;  %v63_v31 = vld [vmem:[%s611_s1 + $0x140] sm:$0xff]  ;;  %v62_v35 = vld [vmem:[%s611_s1 + $0x138] sm:$0xff] }
   0xd   :  { %311 = vmatpush3.msra.mxu1 %v66_v19  ;;  %274 = vmatprep.subr.mxu0 %v49_v20  ;;  %v45_v36 = vld [vmem:[%s611_s1 + $0xb0] sm:$0xff]  ;;  %v44_v40 = vld [vmem:[%s611_s1 + $0xa8] sm:$0xff]  ;;  %v43_v44 = vld [vmem:[%s611_s1 + $0xa0] sm:$0xff] }
   0xe   :  { %312 = vmatprep.subr.mxu1 %v81_v21  ;;  %275 = vmatpush3.msra.mxu0 %v33_v22  ;;  %v77_v37 = vld [vmem:[%s611_s1 + $0x1b0] sm:$0xff]  ;;  %v76_v41 = vld [vmem:[%s611_s1 + $0x1a8] sm:$0xff]  ;;  %v75_v45 = vld [vmem:[%s611_s1 + $0x1a0] sm:$0xff] }
   0xf   :  { %313 = vmatpush3.msra.mxu1 %v65_v23  ;;  %276 = vmatprep.subr.mxu0 %v48_v24  ;;  %v29_v38 = vld [vmem:[%s611_s1 + $0x30] sm:$0xff]  ;;  %v28_v42 = vld [vmem:[%s611_s1 + $0x28] sm:$0xff]  ;;  %v27_v46 = vld [vmem:[%s611_s1 + $0x20] sm:$0xff] }
  0x10   :  { %314 = vmatprep.subr.mxu1 %v80_v25  ;;  %277 = vmatpush3.msra.mxu0 %v32_v26  ;;  %v61_v39 = vld [vmem:[%s611_s1 + $0x130] sm:$0xff]  ;;  %v60_v43 = vld [vmem:[%s611_s1 + $0x128] sm:$0xff]  ;;  %v59_v47 = vld [vmem:[%s611_s1 + $0x120] sm:$0xff] }
  0x11   :  { %315 = vmatpush3.msra.mxu1 %v64_v27  ;;  %278 = vmatprep.subr.mxu0 %v47_v28  ;;  %v42_v48 = vld [vmem:[%s611_s1 + $0x98] sm:$0xff]  ;;  %v41_v52 = vld [vmem:[%s611_s1 + $0x90] sm:$0xff] }
  0x12   :  { %316 = vmatprep.subr.mxu1 %v79_v29  ;;  %279 = vmatpush3.msra.mxu0 %v31_v30  ;;  %v74_v49 = vld [vmem:[%s611_s1 + $0x198] sm:$0xff]  ;;  %v73_v53 = vld [vmem:[%s611_s1 + $0x190] sm:$0xff] }
  0x13   :  { %317 = vmatpush3.msra.mxu1 %v63_v31  ;;  %280 = vmatprep.subr.mxu0 %v46_v32  ;;  %v26_v50 = vld [vmem:[%s611_s1 + $0x18] sm:$0xff] }
  0x14   :  { %318 = vmatprep.subr.mxu1 %v78_v33  ;;  %281 = vmatpush3.msra.mxu0 %v30_v34  ;;  %v58_v51 = vld [vmem:[%s611_s1 + $0x118] sm:$0xff] }
  0x15   :  { %319 = vmatpush3.msra.mxu1 %v62_v35  ;;  %282 = vmatprep.subr.mxu0 %v45_v36 }
  0x16   :  { %320 = vmatprep.subr.mxu1 %v77_v37  ;;  %283 = vmatpush3.msra.mxu0 %v29_v38 }
  0x17   :  { %321 = vmatpush3.msra.mxu1 %v61_v39  ;;  %284 = vmatprep.subr.mxu0 %v44_v40 }
  0x18   :  { %322 = vmatprep.subr.mxu1 %v76_v41  ;;  %285 = vmatpush3.msra.mxu0 %v28_v42 }
  0x19   :  { %323 = vmatpush3.msra.mxu1 %v60_v43  ;;  %286 = vmatprep.subr.mxu0 %v43_v44 }
  0x1a   :  { %324 = vmatprep.subr.mxu1 %v75_v45  ;;  %287 = vmatpush3.msra.mxu0 %v27_v46 }
  0x1b   :  { %325 = vmatpush3.msra.mxu1 %v59_v47 }
  0x1c   :  { %8 = vsyncpa [#allocation3], 0  ;;  %288 = vmatprep.subr.mxu0 %v42_v48  ;;  %326 = vmatprep.subr.mxu1 %v74_v49  ;;  %v25_v54 = vld [vmem:[%s611_s1 + $0x10] sm:$0xff]  ;;  %v40_v56 = vld [vmem:[%s611_s1 + $0x88] sm:$0xff]  ;;  %vm244_vm0 = vcmask 654336  }
  0x1d   :  { %v57_v55 = vld [vmem:[%s611_s1 + $0x110] sm:$0xff]  ;;  %289 = vmatpush3.msra.mxu0 %v26_v50  ;;  %327 = vmatpush3.msra.mxu1 %v58_v51  ;;  %v72_v57 = vld [vmem:[%s611_s1 + $0x188] sm:$0xff]  ;;  %v39_v60 = vld [vmem:[%s611_s1 + $0x80] sm:$0xff] }
  0x1e   :  { %290 = vmatprep.subr.mxu0 %v41_v52  ;;  %328 = vmatprep.subr.mxu1 %v73_v53  ;;  %v24_v58 = vld [vmem:[%s611_s1 + $0x8] sm:$0xff]  ;;  %v71_v61 = vld [vmem:[%s611_s1 + $0x180] sm:$0xff]  ;;  %v18_v1 = vld [vmem:[%s610_s0 + $0x18] sm:$0xff] }
  0x1f   :  { %v56_v59 = vld [vmem:[%s611_s1 + $0x108] sm:$0xff]  ;;  %291 = vmatpush3.msra.mxu0 %v25_v54  ;;  %329 = vmatpush3.msra.mxu1 %v57_v55  ;;  %v23_v62 = vld [vmem:[%s611_s1] sm:$0xff]  ;;  %v17_v3 = vld [vmem:[%s610_s0 + $0x10] sm:$0xff] }
  0x20   :  { %292 = vmatprep.subr.mxu0 %v40_v56  ;;  %330 = vmatprep.subr.mxu1 %v72_v57  ;;  %v16_v63 = vld [vmem:[%s610_s0 + $0x8] sm:$0xff]  ;;  %v55_v0 = vld [vmem:[%s611_s1 + $0x100] sm:$0xff]  ;;  %v22_v5 = vld [vmem:[%s610_s0 + $0x38] sm:$0xff] }
  0x21   :  { %293 = vmatpush3.msra.mxu0 %v24_v58  ;;  %331 = vmatpush3.msra.mxu1 %v56_v59  ;;  %v15_v2 = vld [vmem:[%s610_s0] sm:$0xff]  ;;  %v20_v4 = vld [vmem:[%s610_s0 + $0x28] sm:$0xff]  ;;  %v21_v7 = vld [vmem:[%s610_s0 + $0x30] sm:$0xff] }
  0x22   :  { %294 = vmatprep.subr.mxu0 %v39_v60  ;;  %332 = vmatprep.subr.mxu1 %v71_v61  ;;  %v19_v6 = vld [vmem:[%s610_s0 + $0x20] sm:$0xff]  ;;  %s365_s0 = smov [#allocation2]  }
  0x23   :  { %295 = vmatpush3.msra.mxu0 %v23_v62  ;;  %158 = vmatprep.mubr.f32.mxu0 %v16_v63  ;;  %v263_v10 = vld [vmem:[%s612_s2] ss:$0 sm:$0xff]  ;;  %s252_s22 = sshll.u32 %s365_s0, 4  ;;  %s253_s22 = int_to_ptr.vmem [resolvable:$true] %s252_s22 }
  0x24   :  { %333 = vmatpush3.msra.mxu1 %v55_v0  ;;  %233 = vmatprep.mubr.f32.mxu1 %v18_v1  ;;  %s343_s2 = scalar_lea.vmem %s253_s22, 256  ;;  %p348_p1 = scmp.lt.s32.totalorder %s253_s22, %s253_s22 }
  0x25   :  { %159 = vmatmul.mubr.f32.vlgmr.msra.gmra.mxu0 %v15_v2  ;;  %234 = vmatmul.mubr.f32.vlgmr.msra.gmra.mxu1 %v17_v3  ;;  %p344_p0 = scmp.ne.s32.totalorder %s253_s22, %s343_s2  ;;  %p349_p2 = scmp.lt.s32.totalorder %s343_s2, %s343_s2 }
  0x26   :  { %163 = vmatprep.mubr.f32.mxu0 %v20_v4  ;;  %238 = vmatprep.mubr.f32.mxu1 %v22_v5 }
  0x27   :  { %p350_p3 = por %p349_p2, %p348_p1 }
  0x29   :  { %164 = vmatmul.mubr.f32.gmra.mxu0 %v19_v6  ;;  %239 = vmatmul.mubr.f32.gmra.mxu1 %v21_v7  ;;  %p351_p4 = pnand %p350_p3, %p344_p0 }
  0xe5   :  { %v296_v8 = vpop.f32.mrf.mxu0  ;;  %v334_v9 = vpop.f32.mrf.mxu1 }
  0xe7   :  { %v297_v11 = vpop.f32.mrf.mxu0  ;;  %v335_v12 = vpop.f32.mrf.mxu1 }
  0xe8   :  { %v298_v13 = vadd.f32 %v297_v11, %v296_v8  ;;  %v336_v17 = vadd.f32 %v335_v12, %v334_v9 }
  0xe9   :  { %v299_v14 = vpop.f32.mrf.mxu0  ;;  %v337_v15 = vpop.f32.mrf.mxu1 }
  0xea   :  { %v161_v16 = vadd.f32 %v298_v13, %v263_v10 }
  0xeb   :  { %v300_v18 = vpop.f32.mrf.mxu0  ;;  %v338_v19 = vpop.f32.mrf.mxu1 }
  0xec   :  { %v236_v20 = vadd.f32 %v336_v17, %v161_v16  ;;  %v301_v21 = vadd.f32 %v300_v18, %v299_v14  ;;  %v339_v23 = vadd.f32 %v338_v19, %v337_v15 }
  0xee   :  { %245 = vst.msk [vmem:[#allocation2] sm:$0xff] %vm244_vm0, %v236_v20  ;;  %v166_v22 = vadd.f32 %v301_v21, %v263_v10 }
  0xf0   :  { %v241_v24 = vadd.f32 %v339_v23, %v166_v22 }
  0xf2   :  { %246 = vst.msk [vmem:[#allocation2 + $0x8] sm:$0xff] %vm244_vm0, %v241_v24 }
  0xf3   :  { %354 = shalt.err (!%p351_p4)
}
  0xf4   :  { %s366_s23 = smov 128   ;;  %s367_s24 = smov 8  }
  0xf5   :  { %258 = dma.vmem_to_hbm [thread:$0]  %s253_s22, 256, %s613_s3, [#allocation3], %s366_s23, %s366_s23, %s367_s24  }
  0xf6   :  { %363 = dma.done.wait [#allocation3], 256  }
  0xf7   :  { %364 = vsyncadd [#allocation3], 4294967040 }
  0xf8   :  { %262 = vsyncpa [#allocation3], 1 }

</bundles_post_ra>
